<compile_context>
chip_gen: v7x
topology: tpu7x:2x2x1
jax: 0.10.0
libtpu: 0.0.40
codegen_flags: <defaults>
</compile_context>

<pallas_src>
import functools

import jax
import jax.numpy as jnp
from jax import lax
from jax.experimental import pallas as pl
from jax.experimental.pallas import tpu as pltpu

_NEG_INF = -1e30


# ---------------------------------------------------------------------------
# Pass 1: 1x1-conv projections q / k / v, computed once per (batch, tile).
# ---------------------------------------------------------------------------
def _projection_kernel(x_ref, wq_ref, bq_ref, wk_ref, bk_ref, wv_ref, bv_ref,
                       q_ref, k_ref, v_ref):
    x = x_ref[0].astype(jnp.bfloat16)                                   # [C, T]
    q = jnp.dot(wq_ref[...], x, preferred_element_type=jnp.float32) + bq_ref[...]
    k = jnp.dot(wk_ref[...], x, preferred_element_type=jnp.float32) + bk_ref[...]
    v = jnp.dot(wv_ref[...], x, preferred_element_type=jnp.float32) + bv_ref[...]
    q_ref[0] = q.astype(jnp.bfloat16)                                   # [Cq, T]
    k_ref[0] = k.astype(jnp.bfloat16)                                   # [Cq, T]
    v_ref[0] = v.astype(jnp.bfloat16)                                   # [C, T]


# ---------------------------------------------------------------------------
# Pass 2: flash attention with online softmax + gamma-scaled residual add.
# ---------------------------------------------------------------------------
def _flash_attention_kernel(gamma_ref, xres_ref, q_ref, k_ref, v_ref,
                            out_ref, acc_sc, m_sc, l_sc,
                            *, n_true, tile, mask_kv):
    kv = pl.program_id(2)
    nkv = pl.num_programs(2)

    # ---- once per (batch, query-tile): reset online-softmax state -----------
    @pl.when(kv == 0)
    def _():
        m_sc[...] = jnp.full(m_sc.shape, _NEG_INF, m_sc.dtype)
        l_sc[...] = jnp.zeros(l_sc.shape, l_sc.dtype)
        acc_sc[...] = jnp.zeros(acc_sc.shape, acc_sc.dtype)

    q = q_ref[0]                                                     # [Cq, tq] bf16
    k = k_ref[0]                                                     # [Cq, tk] bf16
    v = v_ref[0]                                                     # [C,  tk] bf16

    # energy[j, i] = sum_c k[c, j] * q[c, i]   -> [tk, tq], f32 accumulation.
    e = lax.dot_general(k, q,
                        dimension_numbers=(((0,), (0,)), ((), ())),
                        preferred_element_type=jnp.float32)

    if mask_kv:  # static: only emitted when N was zero-padded up to the tile
        col = kv * tile + lax.broadcasted_iota(jnp.int32, e.shape, 0)
        e = jnp.where(col < n_true, e, _NEG_INF)

    # ---- online softmax update (all f32) ------------------------------------
    m_prev = m_sc[...]                                               # [1, tq]
    m_new = jnp.maximum(m_prev, jnp.max(e, axis=0, keepdims=True))   # [1, tq]
    p = jnp.exp(e - m_new)                                           # [tk, tq]
    alpha = jnp.exp(m_prev - m_new)                                  # [1, tq]
    l_sc[...] = alpha * l_sc[...] + jnp.sum(p, axis=0, keepdims=True)
    acc_sc[...] = alpha * acc_sc[...] + jnp.dot(
        v, p.astype(jnp.bfloat16), preferred_element_type=jnp.float32)  # [C, tq]
    m_sc[...] = m_new

    # ---- finalize: normalize, gamma-scale, residual add ----------------------
    @pl.when(kv == nkv - 1)
    def _():
        inv_l = pl.reciprocal(l_sc[...], approx=True)                # [1, tq]
        out = gamma_ref[0] * (acc_sc[...] * inv_l) + xres_ref[0].astype(jnp.float32)
        out_ref[0] = out.astype(out_ref.dtype)


def _vmem_bytes_proj(C, Cq, T):
    f32, bf16 = 4, 2
    return (2 * C * T * f32                          # x tile (double-buffered)
            + 2 * (2 * Cq + C) * T * bf16            # q/k/v out tiles (double-buffered)
            + (2 * Cq * C + C * C) * bf16            # weights
            + (2 * Cq + C) * f32                     # biases
            + 3 * C * T * f32)                       # live f32 projection results


def _vmem_bytes_flash(C, Cq, T):
    f32, bf16 = 4, 2
    return (2 * C * T * f32                          # residual x tile
            + 2 * Cq * T * bf16                      # q tile
            + 2 * (Cq + C) * T * bf16                # k / v streams (double-buffered)
            + 2 * C * T * f32                        # output tile
            + C * T * f32 + 2 * T * f32              # acc / m / l scratch
            + 2 * T * T * f32)                       # live energy + p


def self_attention(x_nchw, wq, bq, wk, bk, wv, bv, gamma, *, tile=None):
    """SAGAN self-attention forward, matching the PyTorch module semantics."""
    B, C, W, H = x_nchw.shape
    N = W * H
    Cq = wq.shape[0]
    out_dtype = x_nchw.dtype

    n128 = ((N + 127) // 128) * 128
    if tile is None:
        tile = 512 if C <= 256 else 256      # keep tiles VMEM-safe on v7x (64 MiB)
    T = int(min(tile, n128))
    assert T % 128 == 0, "tile must be a multiple of 128 lanes"
    n_pad = ((N + T - 1) // T) * T
    n_tiles = n_pad // T
    mask_kv = n_pad != N

    # NCHW -> [B, C, N] is a pure reshape (no HBM transpose).
    x_bcn = x_nchw.reshape(B, C, N)
    if mask_kv:
        x_bcn = jnp.pad(x_bcn, ((0, 0), (0, 0), (0, n_pad - N)))

    # bf16 MXU operands; biases / gamma stay f32 (added to f32 accumulators).
    wq_b = wq.astype(jnp.bfloat16)
    wk_b = wk.astype(jnp.bfloat16)
    wv_b = wv.astype(jnp.bfloat16)
    bq2 = bq.reshape(Cq, 1).astype(jnp.float32)
    bk2 = bk.reshape(Cq, 1).astype(jnp.float32)
    bv2 = bv.reshape(C, 1).astype(jnp.float32)
    gamma1 = gamma.reshape(1).astype(jnp.float32)

    vmem_proj = int(min(max(2 * _vmem_bytes_proj(C, Cq, T), 32 * 2 ** 20),
                        64 * 2 ** 20))
    vmem_flash = int(min(max(2 * _vmem_bytes_flash(C, Cq, T), 32 * 2 ** 20),
                         64 * 2 ** 20))

    # ---- pass 1: project q / k / v once per (batch, tile) -------------------
    q_bcn, k_bcn, v_bcn = pl.pallas_call(
        _projection_kernel,
        out_shape=(
            jax.ShapeDtypeStruct((B, Cq, n_pad), jnp.bfloat16),
            jax.ShapeDtypeStruct((B, Cq, n_pad), jnp.bfloat16),
            jax.ShapeDtypeStruct((B, C, n_pad), jnp.bfloat16),
        ),
        grid=(B, n_tiles),
        in_specs=[
            pl.BlockSpec((1, C, T), lambda b, i: (b, 0, i)),         # x
            pl.BlockSpec((Cq, C), lambda b, i: (0, 0)),              # Wq
            pl.BlockSpec((Cq, 1), lambda b, i: (0, 0)),              # bq
            pl.BlockSpec((Cq, C), lambda b, i: (0, 0)),              # Wk
            pl.BlockSpec((Cq, 1), lambda b, i: (0, 0)),              # bk
            pl.BlockSpec((C, C), lambda b, i: (0, 0)),               # Wv
            pl.BlockSpec((C, 1), lambda b, i: (0, 0)),               # bv
        ],
        out_specs=(
            pl.BlockSpec((1, Cq, T), lambda b, i: (b, 0, i)),        # q
            pl.BlockSpec((1, Cq, T), lambda b, i: (b, 0, i)),        # k
            pl.BlockSpec((1, C, T), lambda b, i: (b, 0, i)),         # v
        ),
        compiler_params=pltpu.CompilerParams(
            dimension_semantics=("parallel", "parallel"),
            vmem_limit_bytes=vmem_proj),
    )(x_bcn, wq_b, bq2, wk_b, bk2, wv_b, bv2)

    # ---- pass 2: flash attention + gamma-scaled residual --------------------
    kernel = functools.partial(_flash_attention_kernel,
                               n_true=N, tile=T, mask_kv=mask_kv)

    out_bcn = pl.pallas_call(
        kernel,
        out_shape=jax.ShapeDtypeStruct((B, C, n_pad), out_dtype),
        grid=(B, n_tiles, n_tiles),
        in_specs=[
            pl.BlockSpec(memory_space=pltpu.SMEM),                       # gamma
            pl.BlockSpec((1, C, T), lambda b, qi, kv: (b, 0, qi)),       # x (residual)
            pl.BlockSpec((1, Cq, T), lambda b, qi, kv: (b, 0, qi)),      # q tile
            pl.BlockSpec((1, Cq, T), lambda b, qi, kv: (b, 0, kv)),      # k tile
            pl.BlockSpec((1, C, T), lambda b, qi, kv: (b, 0, kv)),       # v tile
        ],
        out_specs=pl.BlockSpec((1, C, T), lambda b, qi, kv: (b, 0, qi)),
        scratch_shapes=[
            pltpu.VMEM((C, T), jnp.float32),     # output accumulator
            pltpu.VMEM((1, T), jnp.float32),     # running max m
            pltpu.VMEM((1, T), jnp.float32),     # running denom l
        ],
        compiler_params=pltpu.CompilerParams(
            dimension_semantics=("parallel", "parallel", "arbitrary"),
            vmem_limit_bytes=vmem_flash),
    )(gamma1, x_bcn, q_bcn, k_bcn, v_bcn)

    if mask_kv:
        out_bcn = out_bcn[:, :, :N]
    return out_bcn.reshape(B, C, W, H)


def self_attention_reference(x, wq, bq, wk, bk, wv, bv, gamma):
    """Pure-JAX reference mirroring the PyTorch forward exactly (f32)."""
    B, C, W, H = x.shape
    N = W * H
    xf = x.reshape(B, C, N)                                        # [B, C, N]
    q = jnp.einsum('oc,bcn->bon', wq, xf) + bq[None, :, None]      # [B, Cq, N]
    k = jnp.einsum('oc,bcn->bon', wk, xf) + bk[None, :, None]      # [B, Cq, N]
    v = jnp.einsum('oc,bcn->bon', wv, xf) + bv[None, :, None]      # [B, C, N]
    proj_query = q.transpose(0, 2, 1)                              # [B, N, Cq]
    energy = jnp.einsum('bnc,bcm->bnm', proj_query, k)             # [B, N, N]
    attn = jax.nn.softmax(energy, axis=-1)
    out = jnp.einsum('bcn,bmn->bcm', v, attn)                      # [B, C, N]
    out = out.reshape(B, C, W, H)
    return gamma.reshape(()) * out + x


if __name__ == "__main__":
    key = jax.random.PRNGKey(0)
    B, C, W, H = 2, 16, 16, 16          # N = 256 -> 2 query tiles x 2 kv tiles
    Cq = C // 8

    ks = jax.random.split(key, 7)
    x = jax.random.normal(ks[0], (B, C, W, H), jnp.float32)
    wq = jax.random.normal(ks[1], (Cq, C), jnp.float32) * 0.2
    bq = jax.random.normal(ks[2], (Cq,), jnp.float32) * 0.1
    wk = jax.random.normal(ks[3], (Cq, C), jnp.float32) * 0.2
    bk = jax.random.normal(ks[4], (Cq,), jnp.float32) * 0.1
    wv = jax.random.normal(ks[5], (C, C), jnp.float32) * 0.2
    bv = jax.random.normal(ks[6], (C,), jnp.float32) * 0.1
    # module __init__ sets gamma = 0; use a nonzero deterministic value so the
    # attention path is actually exercised (not just the residual).
    gamma = jnp.array([0.5], jnp.float32)

    # tile=128 so the online-softmax KV loop and query tiling are exercised.
    out = self_attention(x, wq, bq, wk, bk, wv, bv, gamma, tile=128)
    out = jax.block_until_ready(out)

    ref = self_attention_reference(x, wq, bq, wk, bk, wv, bv, gamma)
    assert out.shape == (B, C, W, H)
    max_err = float(jnp.max(jnp.abs(out - ref)))
    # bf16 MXU operands with f32 accumulation -> tolerance sized for bf16.
    assert jnp.allclose(out, ref, atol=5e-2, rtol=5e-2), max_err

    print("KERNEL_OK")
</pallas_src>

<mosaic_0001>
module attributes {stable_mosaic.version = 11 : i64} {
  func.func @_projection_kernel(%arg0: i32, %arg1: i32, %arg2: memref<1x16x128xf32, #tpu.memory_space<vmem>>, %arg3: memref<2x16xbf16, #tpu.memory_space<vmem>>, %arg4: memref<2x1xf32, #tpu.memory_space<vmem>>, %arg5: memref<2x16xbf16, #tpu.memory_space<vmem>>, %arg6: memref<2x1xf32, #tpu.memory_space<vmem>>, %arg7: memref<16x16xbf16, #tpu.memory_space<vmem>>, %arg8: memref<16x1xf32, #tpu.memory_space<vmem>>, %arg9: memref<1x2x128xbf16, #tpu.memory_space<vmem>>, %arg10: memref<1x2x128xbf16, #tpu.memory_space<vmem>>, %arg11: memref<1x16x128xbf16, #tpu.memory_space<vmem>>) attributes {dimension_semantics = [#tpu.dimension_semantics<parallel>, #tpu.dimension_semantics<parallel>], iteration_bounds = array<i64: 2, 2>, scalar_prefetch = 0 : i64, scratch_operands = 0 : i64, tpu.core_type = #tpu.core_type<tc>, window_params = [{transform_indices = @transform_0, window_bounds = array<i64: 1, 16, 128>}, {pipeline_mode = #tpu.pipeline_mode<synchronous>, transform_indices = @transform_1, window_bounds = array<i64: 2, 16>}, {pipeline_mode = #tpu.pipeline_mode<synchronous>, transform_indices = @transform_2, window_bounds = array<i64: 2, 1>}, {pipeline_mode = #tpu.pipeline_mode<synchronous>, transform_indices = @transform_3, window_bounds = array<i64: 2, 16>}, {pipeline_mode = #tpu.pipeline_mode<synchronous>, transform_indices = @transform_4, window_bounds = array<i64: 2, 1>}, {pipeline_mode = #tpu.pipeline_mode<synchronous>, transform_indices = @transform_5, window_bounds = array<i64: 16, 16>}, {pipeline_mode = #tpu.pipeline_mode<synchronous>, transform_indices = @transform_6, window_bounds = array<i64: 16, 1>}, {transform_indices = @transform_7, window_bounds = array<i64: 1, 2, 128>}, {transform_indices = @transform_8, window_bounds = array<i64: 1, 2, 128>}, {transform_indices = @transform_9, window_bounds = array<i64: 1, 16, 128>}]} {
    %c0 = arith.constant 0 : index
    %c0_0 = arith.constant 0 : index
    %c0_1 = arith.constant 0 : index
    %0 = vector.load %arg2[%c0, %c0_0, %c0_1] : memref<1x16x128xf32, #tpu.memory_space<vmem>>, vector<1x16x128xf32>
    %1 = vector.shape_cast %0 : vector<1x16x128xf32> to vector<16x128xf32>
    %2 = arith.truncf %1 : vector<16x128xf32> to vector<16x128xbf16>
    %c0_2 = arith.constant 0 : index
    %c0_3 = arith.constant 0 : index
    %3 = vector.load %arg3[%c0_2, %c0_3] : memref<2x16xbf16, #tpu.memory_space<vmem>>, vector<2x16xbf16>
    %cst = arith.constant dense<0.000000e+00> : vector<2x128xf32>
    %4 = tpu.matmul %3, %2, %cst {dimension_numbers = #tpu.dot_dimension_numbers<[1], [0], [0], [1], [0, 0, 1, 1], [], []>} : vector<2x16xbf16>, vector<16x128xbf16>, vector<2x128xf32> -> vector<2x128xf32>
    %c0_4 = arith.constant 0 : index
    %c0_5 = arith.constant 0 : index
    %5 = vector.load %arg4[%c0_4, %c0_5] : memref<2x1xf32, #tpu.memory_space<vmem>>, vector<2x1xf32>
    %6 = vector.broadcast %5 : vector<2x1xf32> to vector<2x128xf32>
    %7 = arith.addf %4, %6 : vector<2x128xf32>
    %c0_6 = arith.constant 0 : index
    %c0_7 = arith.constant 0 : index
    %8 = vector.load %arg5[%c0_6, %c0_7] : memref<2x16xbf16, #tpu.memory_space<vmem>>, vector<2x16xbf16>
    %cst_8 = arith.constant dense<0.000000e+00> : vector<2x128xf32>
    %9 = tpu.matmul %8, %2, %cst_8 {dimension_numbers = #tpu.dot_dimension_numbers<[1], [0], [0], [1], [0, 0, 1, 1], [], []>} : vector<2x16xbf16>, vector<16x128xbf16>, vector<2x128xf32> -> vector<2x128xf32>
    %c0_9 = arith.constant 0 : index
    %c0_10 = arith.constant 0 : index
    %10 = vector.load %arg6[%c0_9, %c0_10] : memref<2x1xf32, #tpu.memory_space<vmem>>, vector<2x1xf32>
    %11 = vector.broadcast %10 : vector<2x1xf32> to vector<2x128xf32>
    %12 = arith.addf %9, %11 : vector<2x128xf32>
    %c0_11 = arith.constant 0 : index
    %c0_12 = arith.constant 0 : index
    %13 = vector.load %arg7[%c0_11, %c0_12] : memref<16x16xbf16, #tpu.memory_space<vmem>>, vector<16x16xbf16>
    %cst_13 = arith.constant dense<0.000000e+00> : vector<16x128xf32>
    %14 = tpu.matmul %13, %2, %cst_13 {dimension_numbers = #tpu.dot_dimension_numbers<[1], [0], [0], [1], [0, 0, 1, 1], [], []>} : vector<16x16xbf16>, vector<16x128xbf16>, vector<16x128xf32> -> vector<16x128xf32>
    %c0_14 = arith.constant 0 : index
    %c0_15 = arith.constant 0 : index
    %15 = vector.load %arg8[%c0_14, %c0_15] : memref<16x1xf32, #tpu.memory_space<vmem>>, vector<16x1xf32>
    %16 = vector.broadcast %15 : vector<16x1xf32> to vector<16x128xf32>
    %17 = arith.addf %14, %16 : vector<16x128xf32>
    %18 = arith.truncf %7 : vector<2x128xf32> to vector<2x128xbf16>
    %c0_16 = arith.constant 0 : index
    %c0_17 = arith.constant 0 : index
    %c0_18 = arith.constant 0 : index
    %19 = vector.load %arg9[%c0_16, %c0_17, %c0_18] : memref<1x2x128xbf16, #tpu.memory_space<vmem>>, vector<1x2x128xbf16>
    %20 = vector.shape_cast %19 : vector<1x2x128xbf16> to vector<2x128xbf16>
    %21 = vector.shape_cast %18 : vector<2x128xbf16> to vector<1x2x128xbf16>
    tpu.vector_store %arg9[%c0_16, %c0_17, %c0_18], %21 {strides = array<i32>} : memref<1x2x128xbf16, #tpu.memory_space<vmem>>, vector<1x2x128xbf16>,
    %22 = arith.truncf %12 : vector<2x128xf32> to vector<2x128xbf16>
    %c0_19 = arith.constant 0 : index
    %c0_20 = arith.constant 0 : index
    %c0_21 = arith.constant 0 : index
    %23 = vector.load %arg10[%c0_19, %c0_20, %c0_21] : memref<1x2x128xbf16, #tpu.memory_space<vmem>>, vector<1x2x128xbf16>
    %24 = vector.shape_cast %23 : vector<1x2x128xbf16> to vector<2x128xbf16>
    %25 = vector.shape_cast %22 : vector<2x128xbf16> to vector<1x2x128xbf16>
    tpu.vector_store %arg10[%c0_19, %c0_20, %c0_21], %25 {strides = array<i32>} : memref<1x2x128xbf16, #tpu.memory_space<vmem>>, vector<1x2x128xbf16>,
    %26 = arith.truncf %17 : vector<16x128xf32> to vector<16x128xbf16>
    %c0_22 = arith.constant 0 : index
    %c0_23 = arith.constant 0 : index
    %c0_24 = arith.constant 0 : index
    %27 = vector.load %arg11[%c0_22, %c0_23, %c0_24] : memref<1x16x128xbf16, #tpu.memory_space<vmem>>, vector<1x16x128xbf16>
    %28 = vector.shape_cast %27 : vector<1x16x128xbf16> to vector<16x128xbf16>
    %29 = vector.shape_cast %26 : vector<16x128xbf16> to vector<1x16x128xbf16>
    tpu.vector_store %arg11[%c0_22, %c0_23, %c0_24], %29 {strides = array<i32>} : memref<1x16x128xbf16, #tpu.memory_space<vmem>>, vector<1x16x128xbf16>,
    return
  }
  func.func @transform_0(%arg0: i32, %arg1: i32) -> (i32, i32, i32) {
    %c0_i32 = arith.constant 0 : i32
    %c0_i32_0 = arith.constant 0 : i32
    return %arg0, %c0_i32, %arg1 : i32, i32, i32
  }
  func.func @transform_1(%arg0: i32, %arg1: i32) -> (i32, i32) {
    %c0_i32 = arith.constant 0 : i32
    %c0_i32_0 = arith.constant 0 : i32
    %c0_i32_1 = arith.constant 0 : i32
    return %c0_i32, %c0_i32_0 : i32, i32
  }
  func.func @transform_2(%arg0: i32, %arg1: i32) -> (i32, i32) {
    %c0_i32 = arith.constant 0 : i32
    %c0_i32_0 = arith.constant 0 : i32
    %c0_i32_1 = arith.constant 0 : i32
    return %c0_i32, %c0_i32_0 : i32, i32
  }
  func.func @transform_3(%arg0: i32, %arg1: i32) -> (i32, i32) {
    %c0_i32 = arith.constant 0 : i32
    %c0_i32_0 = arith.constant 0 : i32
    %c0_i32_1 = arith.constant 0 : i32
    return %c0_i32, %c0_i32_0 : i32, i32
  }
  func.func @transform_4(%arg0: i32, %arg1: i32) -> (i32, i32) {
    %c0_i32 = arith.constant 0 : i32
    %c0_i32_0 = arith.constant 0 : i32
    %c0_i32_1 = arith.constant 0 : i32
    return %c0_i32, %c0_i32_0 : i32, i32
  }
  func.func @transform_5(%arg0: i32, %arg1: i32) -> (i32, i32) {
    %c0_i32 = arith.constant 0 : i32
    %c0_i32_0 = arith.constant 0 : i32
    %c0_i32_1 = arith.constant 0 : i32
    return %c0_i32, %c0_i32_0 : i32, i32
  }
  func.func @transform_6(%arg0: i32, %arg1: i32) -> (i32, i32) {
    %c0_i32 = arith.constant 0 : i32
    %c0_i32_0 = arith.constant 0 : i32
    %c0_i32_1 = arith.constant 0 : i32
    return %c0_i32, %c0_i32_0 : i32, i32
  }
  func.func @transform_7(%arg0: i32, %arg1: i32) -> (i32, i32, i32) {
    %c0_i32 = arith.constant 0 : i32
    %c0_i32_0 = arith.constant 0 : i32
    return %arg0, %c0_i32, %arg1 : i32, i32, i32
  }
  func.func @transform_8(%arg0: i32, %arg1: i32) -> (i32, i32, i32) {
    %c0_i32 = arith.constant 0 : i32
    %c0_i32_0 = arith.constant 0 : i32
    return %arg0, %c0_i32, %arg1 : i32, i32, i32
  }
  func.func @transform_9(%arg0: i32, %arg1: i32) -> (i32, i32, i32) {
    %c0_i32 = arith.constant 0 : i32
    %c0_i32_0 = arith.constant 0 : i32
    return %arg0, %c0_i32, %arg1 : i32, i32, i32
  }
}

</mosaic_0001>

<bundles_post_ra>
// kernel: tpu_custom_call.1
= control target key start
LH: loop header
LB: loop body
LE: loop exit
PB: predicated region body
PF: predicated region fallthrough
CT: control target
= control target key end

     0   :  { %s1479_s0 = inlined_call_operand.hbm [shape: f32[2,16,256], index: 0, kind: input, shape index: {}]   ;;  %s1480_s1 = inlined_call_operand.vmem [shape: bf16[2,16], index: 1, kind: input, shape index: {}]   ;;  %s1481_s2 = inlined_call_operand.vmem [shape: f32[2,1], index: 2, kind: input, shape index: {}]   ;;  %s1482_s3 = inlined_call_operand.vmem [shape: bf16[2,16], index: 3, kind: input, shape index: {}]   ;;  %s1483_s4 = inlined_call_operand.vmem [shape: f32[2,1], index: 4, kind: input, shape index: {}]   ;;  %s1484_s5 = inlined_call_operand.vmem [shape: bf16[16,16], index: 5, kind: input, shape index: {}]   ;;  %s1485_s6 = inlined_call_operand.vmem [shape: f32[16,1], index: 6, kind: input, shape index: {}]   ;;  %s1486_s7 = inlined_call_operand.hbm [shape: bf16[2,2,256], index: 7, kind: output, shape index: {0}]   ;;  %s1487_s8 = inlined_call_operand.hbm [shape: bf16[2,2,256], index: 8, kind: output, shape index: {1}]   ;;  %s1488_s9 = inlined_call_operand.hbm [shape: bf16[2,16,256], index: 9, kind: output, shape index: {2}]  }
   0x1   :  { %1499 = sst [smem:[#allocation16_spill]] %s1479_s0 }
   0x2   :  { %1500 = sst [smem:[#allocation17_spill]] %s1480_s1 }
   0x3   :  { %1501 = sst [smem:[#allocation18_spill]] %s1481_s2 }
   0x4   :  { %1502 = sst [smem:[#allocation19_spill]] %s1482_s3 }
   0x5   :  { %1503 = sst [smem:[#allocation20_spill]] %s1484_s5 }
   0x6   :  { %1504 = sst [smem:[#allocation21_spill]] %s1486_s7 }
   0x7   :  { %1505 = sst [smem:[#allocation22_spill]] %s1487_s8 }
   0x8   :  { %1506 = sst [smem:[#allocation23_spill]] %s1488_s9 }
   0x9   :  { %15 = vsyncpa [#allocation3], 0 }
   0xa   :  { %17 = vsyncpa [#allocation3 + $0x1], 0 }
   0xb   :  { %18 = vsyncpa [#allocation4], 0 }
   0xc   :  { %20 = vsyncpa [#allocation4 + $0x1], 0 }
   0xd   :  { %21 = vsyncpa [#allocation7], 0 }
   0xe   :  { %23 = vsyncpa [#allocation7 + $0x1], 0  ;;  %s1177_s30 = smov 0   ;;  %s1179_s10 = smov 0  }
   0xf   :  { %s1181_s11 = smov 0   ;;  %s1183_s12 = smov 0  }
  0x10   :  { %s1185_s13 = smov 0   ;;  %s1187_s14 = smov 0  }
  0x11   :  { %s1189_s15 = smov 0   ;;  %s1191_s16 = smov 0  }
  0x12 LB: > { %1507 = sst [smem:[#allocation12_spill]] %s1084_s30  ;;  %s1218_s17 = sadd.s32 4294967295, %s1112_s16   ;;  %s1112_s16 = sphi %s1191_s16, %s29_s16   ;;  %s1108_s15 = sphi %s1189_s15, %s1538_s15   ;;  %s1104_s14 = sphi %s1187_s14, %s1537_s14   ;;  %s1100_s13 = sphi %s1185_s13, %s1536_s13   ;;  %s1096_s12 = sphi %s1183_s12, %s1535_s12   ;;  %s1092_s11 = sphi %s1181_s11, %s1534_s11   ;;  %s1088_s10 = sphi %s1179_s10, %s1533_s10   ;;  %s1084_s30 = sphi %s1177_s30, %s1532_s30  }
  0x13   : > { %s1497_s18 = sadd.s32 4294967294, %s1112_s16   ;;  %s38_s19 = sadd.s32 1, %s1104_s14 }
  0x14   : > { %s41_s20 = sadd.s32 1, %s1108_s15  ;;  %p39_p0 = scmp.ge.s32.totalorder %s38_s19, 2 }
  0x15   : > { %s50_s21 = sadd.s32 1, %s1092_s11  ;;  %p57_p1 = scmp.ne.s32.totalorder %s1092_s11, %s1088_s10 }
  0x16   : > { %p58_p2 = scmp.eq.s32.totalorder %s1112_s16, 0  ;;  %s1540_s19 = smov (%p39_p0, %s38_s19), 0 }
  0x17   : > { %1508 = sst [smem:[#allocation13_spill]] %s1540_s19  ;;  %s1542_s20 = smov (!%p39_p0, %s41_s20), %s1108_s15 }
  0x18   : > { %s46_s22 = ssub.s32 %s1104_s14, %s1540_s19  ;;  %p1232_p3 = por %p58_p2, %p57_p1 }
  0x19   : > { %p43_p4 = scmp.ge.s32.totalorder %s1542_s20, 2  ;;  %p63_p5 = scmp.ne.s32.totalorder %s1088_s10, %s1084_s30 }
  0x1a   : > { %p64_p6 = scmp.eq.s32.totalorder %s1218_s17, 0  ;;  %p215_p7 = scmp.eq.s32.totalorder %s1218_s17, 3 }
  0x1b   : > { %s1544_s20 = smov (%p43_p4, %s1542_s20), 0  ;;  %p221_p10 = scmp.eq.s32.totalorder %s1497_s18, 3 }
  0x1c   : > { %1510 = sst [smem:[#allocation14_spill]] %s1544_s20  ;;  %p1242_p8 = por %p64_p6, %p63_p5 }
  0x1d   : > { %p1246_p9 = por %p215_p7, %p57_p1  ;;  %s45_s26 = ssub.s32 %s1108_s15, %s1544_s20 }
  0x1e   : > { %s47_s27 = sor.u32 %s46_s22, %s45_s26  ;;  %p1254_p12 = por %p221_p10, %p63_p5 }
  0x1f   : > { %s1512_s25 = scalar_select %p1246_p9, 1, 0 }
  0x20   : > { %p48_p11 = scmp.eq.s32.totalorder %s47_s27, 0  ;;  %p846_p13 = scmp.lt.s32.totalorder %s1112_s16, 4 }
  0x21   : > { %1513 = sst [smem:[#allocation15_spill]] %s1512_s25  ;;  %s315_s29 = sand.u32 1, %s1092_s11  }
  0x22   : > { %s1514_s28 = scalar_select %p1254_p12, 1, 0 }
  0x23   : > { %s1261_s19 = scalar_select %p48_p11, %s1092_s11, %s50_s21  }
  0x24   : > { %s772_s30 = sshll.u32 %s315_s29, 4  ;;  %s773_s9 = sshll.u32 %s1108_s15, 2 }
  0x25   : > { %s324_s7 = sadd.s32 %s1104_s14, %s773_s9  ;;  %s319_s8 = scalar_lea.vmem [#allocation2], %s772_s30 }
  0x26   : > { %s327_s5 = sshll.u32 %s319_s8, 4  ;;  %s774_s25 = sshll.u32 %s324_s7, 7  ;;  %s1265_s5 = int_to_ptr.vmem [resolvable:$true] %s327_s5 }
  0x27   : > { %s1515_s0 = sld [smem:[#allocation16_spill]]  ;;  %p1274_p0 = pnand %p846_p13, %p1232_p3 }
  0x28   : > { %s1278_s8 = scalar_lea.sflag [#allocation3], %s315_s29 }
  0x29   : > { %p926_p2 = pneg %p1274_p0 }
  0x2d   : > { %s1270_s22 = scalar_lea.hbm %s1515_s0, %s774_s25  ;;  %s929_s18 = scalar_lea.hbm %s1515_s0, 1024 }
  0x2e   : > { %s924_s7 = scalar_lea.hbm %s1270_s22, 256  ;;  %p930_p3 = scmp.lt.u32.totalorder %s1270_s22, %s1515_s0 }
  0x2f   : > { %p925_p1 = scmp.ne.s32.totalorder %s1270_s22, %s924_s7  ;;  %p931_p6 = scmp.lt.u32.totalorder %s929_s18, %s924_s7 }
  0x30   : > { %p933_p10 = scmp.lt.u32.totalorder %s924_s7, %s1270_s22 }
  0x31   : > { %p927_p4 = pnand %p926_p2, %p925_p1  ;;  %p932_p7 = por %p931_p6, %p930_p3 }
  0x33   : > { %p928_p5 = pneg %p927_p4  ;;  %p934_p11 = por %p933_p10, %p932_p7 }
  0x35   : > { %p935_p13 = pnand %p934_p11, %p928_p5 }
  0x37   : > { %938 = shalt.err (!%p935_p13)
}
  0x38   : > { %s939_s25 = scalar_lea.vmem %s1265_s5, 256  ;;  %s1114_s26 = smov [#allocation2]  }
  0x39   : > { %p940_p1 = scmp.ne.s32.totalorder %s1265_s5, %s939_s25  ;;  %s944_s27 = sshll.u32 %s1114_s26, 4  ;;  %s945_s27 = int_to_ptr.vmem [resolvable:$false] %s944_s27 }
  0x3a   : > { %s946_s29 = scalar_lea.vmem %s945_s27, 512  ;;  %p947_p9 = scmp.lt.s32.totalorder %s1265_s5, %s945_s27 }
  0x3b   : > { %p942_p4 = pnand %p940_p1, %p926_p2  ;;  %p948_p3 = scmp.lt.s32.totalorder %s946_s29, %s939_s25 }
  0x3d   : > { %p943_p12 = pneg %p942_p4  ;;  %p949_p6 = por %p948_p3, %p947_p9 }
  0x3f   : > { %p950_p7 = pnand %p949_p6, %p943_p12 }
  0x41   : > { %953 = shalt.err (!%p950_p7)
}
  0x42   : > { %s1115_s7 = smov 256   ;;  %s1116_s9 = smov 128  }
  0x43   : > { %s1117_s30 = smov 8   ;;  %p775_p2 = scmp.ge.s32.totalorder %s1112_s16, 1 }
  0x44   : > { %835 = dma.hbm_to_vmem [thread:$0]  (!%p1274_p0), %s1270_s22, 256, %s1265_s5, %s1278_s8, %s1115_s7, %s1116_s9, %s1117_s30  }
  0x45   : > { %p335_p5 = scmp.lt.s32.totalorder %s1112_s16, 5 }
  0x47   : > { %p336_p10 = pnand %p775_p2, %p335_p5 }
  0x48   : > { %s1309_s18 = sand.u32 (!%p336_p10), 1, %s1088_s10  }
  0x49   : > { %339 = sbr.rel (%p336_p10) target bundleno = 370 (0x172), region = 48  ;;  %s776_s20 = sshll.u32 (!%p336_p10), %s1309_s18, 4 }
  0x4a   : > { %s342_s23 = scalar_lea.sflag (!%p336_p10), [#allocation3], %s1309_s18  ;;  %s345_s25 = scalar_lea.vmem (!%p336_p10), [#allocation2], %s776_s20 }
  0x50   : > { %1071 = dma.done.wait (%p1242_p8), %s342_s23, 256  }
  0x51   : > { %1073 = vsyncadd (%p1242_p8), %s342_s23, 4294967040  ;;  %v1118_v0 = vmov 0.0   ;;  %vm1119_vm0 = vmmov 0   ;;  %v1120_v1 = vmov 0   ;;  %v389_v2 = vld [vmem:[%s345_s25] sm:$0xff]  ;;  %v390_v3 = vld [vmem:[%s345_s25 + $0x8] sm:$0xff] }
  0x52   : > { %806 = vmatprep.subr.bf16.mxu0 %v1118_v0  ;;  %808 = vmatprep.mubr.msk.bf16.mxu0 %vm1119_vm0, %v1118_v0  ;;  %v391_v4 = vpack.c.bf16 %v390_v3, %v389_v2  ;;  %v444_v5 = vld [vmem:[%s1483_s4] sm:$0x3]  ;;  %s1517_s1 = sld [smem:[#allocation17_spill]]  ;;  %vm399_vm1 = vcmask 130048   ;;  %s1518_s3 = sld [smem:[#allocation19_spill]]  ;;  %v496_v10 = vld [vmem:[%s1485_s6 + $0x8] sm:$0xff] }
  0x53   : > { %812 = vmatprep.subr.bf16.mxu1 %v1118_v0  ;;  %814 = vmatprep.mubr.msk.bf16.mxu1 %vm1119_vm0, %v1118_v0  ;;  %v495_v8 = vld [vmem:[%s1485_s6] sm:$0xff]  ;;  %s1519_s2 = sld [smem:[#allocation18_spill]]  ;;  %s1520_s5 = sld [smem:[#allocation20_spill]] }
  0x54   : > { %921 = vset.pattern.permute.xlu0 %v1120_v1  ;;  %922 = vset.pattern.permute.xlu1 %v1120_v1  ;;  %s785_s22 = sshll.u32 %s1100_s13, 1  ;;  %s574_s21 = sand.u32 1, %s1218_s17  }
  0x55   : > { %807 = vmatpush3.bf16.msra.mxu0 %v391_v4  ;;  %813 = vmatpush3.bf16.msra.mxu1 %v391_v4  ;;  %s590_s24 = sadd.s32 %s1096_s12, %s785_s22  ;;  %s380_s27 = scalar_lea.vmem [#allocation6], %s1309_s18 }
  0x56   : > { %818 = vmatprep.subr.bf16.mxu0 %v1118_v0  ;;  %447 = vperm.xlu0 %921, %v444_v5   ;;  %s786_s8 = sshll.u32 %s590_s24, 4  ;;  %s609_s29 = sshll.u32 %s380_s27, 4  ;;  %s1356_s29 = int_to_ptr.vmem [resolvable:$true] %s609_s29 }
  0x57   : > { %499 = vperm.xlu1 %922, %v495_v8   ;;  %s374_s7 = scalar_lea.vmem [#allocation5], %s1309_s18  ;;  %s789_s30 = sshll.u32 %s1100_s13, 2 }
  0x58   : > { %v392_v6 = vld [vmem:[%s1517_s1] sm:$0x1]  ;;  %s594_s9 = sshll.u32 %s374_s7, 4  ;;  %s1521_s25 = sld [smem:[#allocation22_spill]]  ;;  %s1365_s9 = int_to_ptr.vmem [resolvable:$true] %s594_s9 }
  0x59   : > { %v443_v7 = vld [vmem:[%s1518_s3] sm:$0x1]  ;;  %809 = vmatmul.mubr.msk.bf16.vlgmr.msra.gmra.mrb[0].mxu0 %vm399_vm1, %v392_v6  ;;  %s1522_s17 = sld [smem:[#allocation15_spill]]  ;;  %s1523_s24 = sld [smem:[#allocation21_spill]] }
  0x5a   : > { %v393_v9 = vld [vmem:[%s1519_s2] sm:$0x3]  ;;  %815 = vmatmul.mubr.msk.bf16.vlgmr.msra.gmra.mrb[0].mxu1 %vm399_vm1, %v443_v7  ;;  %819 = vmatpush3.bf16.msra.mxu0 %v391_v4  ;;  %s1368_s20 = sadd.s32 %s1096_s12, %s789_s30  ;;  %s1370_s23 = scalar_lea.sflag [#allocation7], %s574_s21 }
  0x5b   : > { %820 = vmatprep.mubr.msk.bf16.mxu0 %vm1119_vm0, %v1118_v0  ;;  %396 = vperm.xlu0 %921, %v393_v9   ;;  %v923_v11 = vld [vmem:[%s1520_s5] sm:$0xff]   ;;  %s954_s0 = scalar_lea.vmem %s1356_s29, 16  ;;  %s1121_s1 = smov [#allocation6]  }
  0x5c   : > { %504 = vperm.xlu1 %922, %v496_v10   ;;  %p955_p8 = scmp.ne.s32.totalorder %s1356_s29, %s954_s0  ;;  %s958_s2 = sshll.u32 %s1121_s1, 4  ;;  %s959_s2 = int_to_ptr.vmem [resolvable:$false] %s958_s2 }
  0x5d   : > { %s960_s3 = scalar_lea.vmem %s959_s2, 32  ;;  %p961_p11 = scmp.lt.s32.totalorder %s1356_s29, %s959_s2 }
  0x5e   : > { %s1354_s5 = scalar_lea.hbm %s1521_s25, %s786_s8  ;;  %p962_p13 = scmp.lt.s32.totalorder %s960_s3, %s954_s0 }
  0x5f   : > { %s1363_s26 = scalar_lea.hbm %s1523_s24, %s786_s8  ;;  %p1524_p9 = scmp.ne.s32.totalorder %s1522_s17, 0 }
  0x60   : > { %p963_p1 = por %p962_p13, %p961_p11 }
  0x61   : > { %821 = vmatmul.mubr.msk.bf16.vlgmr.msra.gmra.mrb[4].mxu0 %vm399_vm1, %v923_v11  ;;  %p956_p12 = pnand %p955_p8, %p1524_p9 }
  0x63   : > { %p957_p0 = pneg %p956_p12 }
  0x65   : > { %p964_p4 = pnand %p963_p1, %p957_p0 }
  0xd5   : > { %v448_v12 = vpop.permute.xlu0 %447 }
  0xd6   : > { %v1358_v26 = vpop.permute.xlu1 %499 }
  0xda   : > { %v397_v13 = vpop.permute.xlu0 %396 }
 0x12c   : > { %v437_v14 = vpop.f32.mrb[0].mxu0 }
 0x12d   : > { %v487_v15 = vpop.f32.mrb[0].mxu1  ;;  %v438_v16 = vadd.f32 %v437_v14, %v397_v13  ;;  %v810_v17 = vpop.f32.mrb[1].mxu0 }
 0x12e   : > { %v488_v18 = vadd.f32 %v487_v15, %v448_v12  ;;  %v816_v19 = vpop.f32.mrb[1].mxu1  ;;  %v440_v20 = vpop.f32.mrb[2].mxu0 }
 0x12f   : > { %v490_v21 = vpop.f32.mrb[2].mxu1  ;;  %v556_v22 = vpack.c.bf16 %v438_v16, %v438_v16  ;;  %v811_v23 = vpop.f32.mrb[3].mxu0 }
 0x130   : > { %v558_v24 = vpack.c.bf16 %v488_v18, %v488_v18  ;;  %v817_v25 = vpop.f32.mrb[3].mxu1 }
 0x131   : > { %557 = vst [vmem:[%s374_s7] sm:$0x1] %v556_v22 }
 0x132   : > { %559 = vst [vmem:[%s380_s27] sm:$0x1] %v558_v24 }
 0x133   : > { %967 = shalt.err (!%p964_p4)
}
 0x134   : > { %s968_s12 = scalar_lea.hbm %s1354_s5, 16  ;;  %s972_s1 = scalar_lea.hbm %s1521_s25, 64 }
 0x135   : > { %p969_p3 = scmp.ne.s32.totalorder %s1354_s5, %s968_s12  ;;  %p973_p2 = scmp.lt.u32.totalorder %s1354_s5, %s1521_s25 }
 0x136   : > { %p974_p5 = scmp.lt.u32.totalorder %s972_s1, %s968_s12  ;;  %p976_p8 = scmp.lt.u32.totalorder %s968_s12, %s1354_s5 }
 0x137   : > { %p970_p6 = pnand %p969_p3, %p1524_p9 }
 0x138   : > { %p975_p10 = por %p974_p5, %p973_p2 }
 0x139   : > { %p971_p7 = pneg %p970_p6 }
 0x13a   : > { %p977_p12 = por %p976_p8, %p975_p10 }
 0x13c   : > { %p978_p0 = pnand %p977_p12, %p971_p7 }
 0x13e   : > { %981 = shalt.err (!%p978_p0)
}
 0x13f   : > { %827 = dma.vmem_to_hbm [thread:$0]  (%p1524_p9), %s1356_s29, 16, %s1354_s5, %s1370_s23  }
 0x140   : > { %s571_s0 = scalar_lea.sflag [#allocation4], %s1309_s18  ;;  %s982_s3 = scalar_lea.vmem %s1365_s9, 16 }
 0x141   : > { %p983_p11 = scmp.ne.s32.totalorder %s1365_s9, %s982_s3  ;;  %s1122_s7 = smov [#allocation5]  }
 0x142   : > { %s986_s30 = sshll.u32 %s1122_s7, 4  ;;  %s987_s30 = int_to_ptr.vmem [resolvable:$false] %s986_s30 }
 0x143   : > { %p984_p13 = pnand %p983_p11, %p1524_p9  ;;  %s988_s13 = scalar_lea.vmem %s987_s30, 32 }
 0x144   : > { %p989_p4 = scmp.lt.s32.totalorder %s1365_s9, %s987_s30  ;;  %p990_p3 = scmp.lt.s32.totalorder %s988_s13, %s982_s3 }
 0x145   : > { %p985_p1 = pneg %p984_p13 }
 0x146   : > { %p991_p6 = por %p990_p3, %p989_p4 }
 0x148   : > { %p992_p7 = pnand %p991_p6, %p985_p1 }
 0x14a   : > { %995 = shalt.err (!%p992_p7)
}
 0x14b   : > { %s996_s29 = scalar_lea.hbm %s1363_s26, 16  ;;  %s1000_s12 = scalar_lea.hbm %s1523_s24, 64 }
 0x14c   : > { %p997_p2 = scmp.ne.s32.totalorder %s1363_s26, %s996_s29  ;;  %p1001_p8 = scmp.lt.u32.totalorder %s1363_s26, %s1523_s24 }
 0x14d   : > { %p1002_p12 = scmp.lt.u32.totalorder %s1000_s12, %s996_s29  ;;  %p1004_p11 = scmp.lt.u32.totalorder %s996_s29, %s1363_s26 }
 0x14e   : > { %p998_p5 = pnand %p997_p2, %p1524_p9 }
 0x14f   : > { %p1003_p0 = por %p1002_p12, %p1001_p8 }
 0x150   : > { %p999_p10 = pneg %p998_p5 }
 0x151   : > { %p1005_p13 = por %p1004_p11, %p1003_p0 }
 0x153   : > { %p1006_p1 = pnand %p1005_p13, %p999_p10 }
 0x155   : > { %1009 = shalt.err (!%p1006_p1)
}
 0x156   : > { %826 = dma.vmem_to_hbm [thread:$0]  (%p1524_p9), %s1365_s9, 16, %s1363_s26, %s571_s0   ;;  %v549_v27 = vpop.f32.mrb[4].mxu0  ;;  %v505_v29 = vpop.permute.xlu1 %504 }
 0x157   : > { %s1525_s1 = sshll.u32 %s1309_s18, 3  ;;  %v822_v28 = vpop.f32.mrb[5].mxu0  ;;  %s790_s3 = sshll.u32 %s1368_s20, 6  ;;  %v550_v31 = vadd.f32 %v549_v27, %v1358_v26 }
 0x158   : > { %s387_s27 = scalar_lea.vmem [#allocation8], %s1525_s1  ;;  %v552_v30 = vpop.f32.mrb[6].mxu0  ;;  %s1526_s9 = sld [smem:[#allocation23_spill]] }
 0x159   : > { %s623_s2 = sshll.u32 %s387_s27, 4  ;;  %v553_v32 = vadd.f32 %v552_v30, %v505_v29  ;;  %v823_v33 = vpop.f32.mrb[7].mxu0  ;;  %s1123_s20 = smov [#allocation8]   ;;  %s1420_s2 = int_to_ptr.vmem [resolvable:$true] %s623_s2 }
 0x15a   : > { %s1010_s0 = scalar_lea.vmem %s1420_s2, 128  ;;  %s1014_s30 = sshll.u32 %s1123_s20, 4  ;;  %s1015_s30 = int_to_ptr.vmem [resolvable:$false] %s1014_s30 }
 0x15b   : > { %v798_v34 = vpack.c.bf16 %v553_v32, %v550_v31  ;;  %p1011_p4 = scmp.ne.s32.totalorder %s1420_s2, %s1010_s0  ;;  %s1016_s13 = scalar_lea.vmem %s1015_s30, 256 }
 0x15c   : > { %p1017_p7 = scmp.lt.s32.totalorder %s1420_s2, %s1015_s30  ;;  %p1018_p2 = scmp.lt.s32.totalorder %s1016_s13, %s1010_s0 }
 0x15d   : > { %799 = vst [vmem:[%s387_s27] sm:$0xff] %v798_v34   ;;  %p1012_p3 = pnand %p1011_p4, %p1524_p9 }
 0x15e   : > { %s1425_s18 = scalar_lea.hbm %s1526_s9, %s790_s3  ;;  %p1019_p5 = por %p1018_p2, %p1017_p7 }
 0x15f   : > { %p1013_p6 = pneg %p1012_p3 }
 0x161   : > { %p1020_p10 = pnand %p1019_p5, %p1013_p6 }
 0x163   : > { %1023 = shalt.err (!%p1020_p10)
}
 0x164   : > { %s1024_s29 = scalar_lea.hbm %s1425_s18, 128  ;;  %s1028_s12 = scalar_lea.hbm %s1526_s9, 512 }
 0x165   : > { %p1025_p8 = scmp.ne.s32.totalorder %s1425_s18, %s1024_s29  ;;  %p1029_p11 = scmp.lt.u32.totalorder %s1425_s18, %s1526_s9 }
 0x166   : > { %p1030_p13 = scmp.lt.u32.totalorder %s1028_s12, %s1024_s29  ;;  %p1032_p4 = scmp.lt.u32.totalorder %s1024_s29, %s1425_s18 }
 0x167   : > { %p1026_p12 = pnand %p1025_p8, %p1524_p9 }
 0x168   : > { %p1031_p1 = por %p1030_p13, %p1029_p11 }
 0x169   : > { %p1027_p0 = pneg %p1026_p12 }
 0x16a   : > { %p1033_p3 = por %p1032_p4, %p1031_p1 }
 0x16c   : > { %p1034_p6 = pnand %p1033_p3, %p1027_p0 }
 0x16e   : > { %1037 = shalt.err (!%p1034_p6)
}
 0x16f   : > { %s1124_s1 = smov 64   ;;  %s1125_s27 = smov 128  }
 0x170   : > { %s1126_s3 = smov 4  }
 0x171   : > { %828 = dma.vmem_to_hbm [thread:$0]  (%p1524_p9), %s1420_s2, 128, %s1425_s18, %s1370_s23, %s1124_s1, %s1125_s27, %s1126_s3  }
 0x172 PF: > { %s1527_s7 = sld [smem:[#allocation12_spill]]  ;;  %p847_p7 = scmp.ge.s32.totalorder %s1112_s16, 2 }
 0x173   : > { %p1528_p2 = scmp.ne.s32.totalorder %s1514_s28, 0 }
 0x175   : > { %p837_p5 = pnand %p847_p7, %p1528_p2 }
 0x178   : > { %s638_s26 = sand.u32 1, %s1527_s7  }
 0x179   : > { %s639_s0 = scalar_lea.sflag [#allocation4], %s638_s26 }
 0x17a   : > { %1075 = dma.done.wait (!%p837_p5), %s639_s0, 16  }
 0x17b   : > { %1077 = vsyncadd (!%p837_p5), %s639_s0, 4294967280  ;;  %s1529_s20 = sadd.s32 4294967294, %s1112_s16  }
 0x17c   : > { %s646_s30 = sand.u32 1, %s1529_s20  }
 0x17d   : > { %s647_s13 = scalar_lea.sflag [#allocation7], %s646_s30 }
 0x17e   : > { %1079 = dma.done.wait (!%p837_p5), %s647_s13, 144  }
 0x17f   : > { %1081 = vsyncadd (!%p837_p5), %s647_s13, 4294967152  ;;  %s29_s16 = sadd.s32 1, %s1112_s16   ;;  %s1530_s17 = sld [smem:[#allocation13_spill]] }
 0x180   : > { %p26_p9 = scmp.ge.s32.totalorder %s29_s16, 6   ;;  %s1531_s28 = sld [smem:[#allocation14_spill]] }
 0x181   : > { %s1532_s30 = smov %s1088_s10  ;;  %s1533_s10 = smov %s1092_s11 }
 0x182   : > { %s1534_s11 = smov %s1261_s19  ;;  %s1535_s12 = smov %s1104_s14 }
 0x183   : > { %s1536_s13 = smov %s1108_s15  ;;  %28 = sbr.rel (!%p26_p9) target bundleno = 18 (0x12), region = 125 }
 0x185   : > { %s1537_s14 = smov %s1530_s17 }
 0x186   : > { %s1538_s15 = smov %s1531_s28 }
 0x18a   :  { %660 = vsyncpa [#allocation3], 1 }
 0x18b   :  { %662 = vsyncpa [#allocation3 + $0x1], 1 }
 0x18c   :  { %663 = vsyncpa [#allocation4], 1 }
 0x18d   :  { %665 = vsyncpa [#allocation4 + $0x1], 1 }
 0x18e   :  { %666 = vsyncpa [#allocation7], 1 }
 0x18f   :  { %668 = vsyncpa [#allocation7 + $0x1], 1 }

</bundles_post_ra>
